<compile_context>
chip_gen: v6e
topology: v6e:2x2x1
jax: 0.10.0
libtpu: 0.0.40
codegen_flags: <defaults>
</compile_context>

<pallas_src>
import jax
import jax.numpy as jnp
from jax.experimental import pallas as pl
from jax.experimental.pallas import tpu as pltpu


def _linear_kernel(x_ref, w_ref, b_ref, o_ref):
    # x_ref: (TM, p*d_inp), w_ref: (p*d_inp, p*d_model), b_ref: (1, p*d_model)
    y = jnp.dot(x_ref[...], w_ref[...], preferred_element_type=jnp.float32)
    o_ref[...] = (y + b_ref[...]).astype(o_ref.dtype)


def time_feature_embedding(
    x,
    w_t,
    b,
    *,
    tile_rows=4096,            # packed-output rows per tile (rounded to mult of 8)
    min_rows_for_pallas=4096,  # below this, plain XLA beats kernel overhead
    force_pallas=False,
    out_dtype=None,            # e.g. jnp.bfloat16 to halve output HBM traffic
    vmem_limit_bytes=None,     # raise if you push tile_rows past ~8192
):
    """x: (B, S, d_inp); w_t: (d_inp, d_model); b: (d_model,)."""
    B, S, d_inp = x.shape
    d_model = w_t.shape[1]
    out_dtype = x.dtype if out_dtype is None else out_dtype

    M = B * S
    x2 = x.reshape(M, d_inp)

    # Tiny problems: Pallas launch + DMA-setup overhead dominates -> plain XLA.
    if not force_pallas and M < min_rows_for_pallas:
        return (x2 @ w_t + b).astype(out_dtype).reshape(B, S, d_model)

    # Row-packing factor p: make the kernel's output last dim lane-dense (128).
    if d_model < 128 and 128 % d_model == 0:
        p = 128 // d_model
    else:
        p = 1

    if p > 1:
        # Block-diagonal weight: p copies of w_t on the diagonal.
        w_big = jnp.kron(jnp.eye(p, dtype=w_t.dtype), w_t)  # (p*d_inp, p*d_model)
        b_big = jnp.tile(b, p).reshape(1, p * d_model)
    else:
        w_big = w_t
        b_big = b.reshape(1, d_model)

    # Pad M only up to a multiple of p (<= p-1 rows); the ragged last row tile
    # is handled by Pallas with masked stores (grid uses cdiv below).
    M_pad = -(-M // p) * p
    if M_pad != M:
        x2 = jnp.pad(x2, ((0, M_pad - M), (0, 0)))
    Mp = M_pad // p
    xp = x2.reshape(Mp, p * d_inp)

    # Row tile: force a multiple of 8 (>= 8), never larger than needed.
    TM = max(8, (int(tile_rows) // 8) * 8)
    TM = min(TM, -(-Mp // 8) * 8)
    grid = (pl.cdiv(Mp, TM),)

    out_itemsize = jnp.dtype(out_dtype).itemsize
    cost = pl.CostEstimate(
        flops=2 * M * d_inp * d_model,
        transcendentals=0,
        bytes_accessed=(
            xp.size * xp.dtype.itemsize
            + w_big.size * w_big.dtype.itemsize
            + b_big.size * b_big.dtype.itemsize
            + Mp * p * d_model * out_itemsize
        ),
    )

    out = pl.pallas_call(
        _linear_kernel,
        out_shape=jax.ShapeDtypeStruct((Mp, p * d_model), out_dtype),
        grid_spec=pltpu.PrefetchScalarGridSpec(
            num_scalar_prefetch=0,
            grid=grid,
            in_specs=[
                # Row tiles of packed input stream through the pipeline.
                pl.BlockSpec((TM, p * d_inp), lambda i: (i, 0)),
                # Weight & bias: constant index map -> resident in VMEM.
                pl.BlockSpec((p * d_inp, p * d_model), lambda i: (0, 0)),
                pl.BlockSpec((1, p * d_model), lambda i: (0, 0)),
            ],
            out_specs=pl.BlockSpec((TM, p * d_model), lambda i: (i, 0)),
        ),
        compiler_params=pltpu.CompilerParams(
            # Independent row tiles: lets Mosaic shard across both TCs on v7x.
            dimension_semantics=("parallel",),
            vmem_limit_bytes=vmem_limit_bytes,
        ),
        cost_estimate=cost,
    )(xp, w_big, b_big)

    # Unpack: (Mp, p*d_model) -> (M_pad, d_model); drop the (tiny) pad if any.
    y = out.reshape(M_pad, d_model)
    if M_pad != M:
        y = y[:M]
    return y.reshape(B, S, d_model)


if __name__ == "__main__":
    # freq='h' -> d_inp = 4 ; choose d_model = 32, batch = 2, seq = 8
    d_inp, d_model = 4, 32
    B, S = 2, 8

    key = jax.random.PRNGKey(0)
    kx, kw, kb = jax.random.split(key, 3)

    x = jax.random.normal(kx, (B, S, d_inp), dtype=jnp.float32)
    # PyTorch weight is (d_model, d_inp); we store its transpose (d_inp, d_model).
    w_t = jax.random.normal(kw, (d_inp, d_model), dtype=jnp.float32) * (1.0 / jnp.sqrt(d_inp))
    b = jax.random.normal(kb, (d_model,), dtype=jnp.float32) * 0.01

    # 1) Tiny demo shape: force the Pallas path so the kernel itself is tested.
    y = time_feature_embedding(x, w_t, b, force_pallas=True)
    jax.block_until_ready(y)
    y_ref = x @ w_t + b
    assert y.shape == (B, S, d_model)
    assert jnp.allclose(y, y_ref, atol=1e-5, rtol=1e-5)

    # 2) Larger shape: multi-tile pipelined grid with a ragged (masked) last block.
    B2, S2 = 4, 2049  # M = 8196: divisible by p=4, not by TM -> partial last tile
    x2 = jax.random.normal(jax.random.PRNGKey(1), (B2, S2, d_inp), dtype=jnp.float32)
    y2 = time_feature_embedding(x2, w_t, b, tile_rows=512, force_pallas=True)
    jax.block_until_ready(y2)
    y2_ref = x2 @ w_t + b
    assert y2.shape == (B2, S2, d_model)
    assert jnp.allclose(y2, y2_ref, atol=1e-5, rtol=1e-5)

    # 3) bf16 output path (recommended downstream): halves output HBM traffic.
    y3 = time_feature_embedding(
        x2, w_t, b, tile_rows=512, force_pallas=True, out_dtype=jnp.bfloat16
    )
    jax.block_until_ready(y3)
    assert y3.dtype == jnp.bfloat16
    assert jnp.allclose(y3.astype(jnp.float32), y2_ref, atol=5e-2, rtol=5e-2)

    print("KERNEL_OK")
</pallas_src>

<mosaic_0001>
module attributes {stable_mosaic.version = 11 : i64} {
  func.func @_linear_kernel(%arg0: i32, %arg1: memref<8x16xf32, #tpu.memory_space<vmem>>, %arg2: memref<16x128xf32, #tpu.memory_space<vmem>>, %arg3: memref<1x128xf32, #tpu.memory_space<vmem>>, %arg4: memref<8x128xf32, #tpu.memory_space<vmem>>) attributes {dimension_semantics = [#tpu.dimension_semantics<parallel>], iteration_bounds = array<i64: 1>, scalar_prefetch = 0 : i64, scratch_operands = 0 : i64, tpu.core_type = #tpu.core_type<tc>, window_params = [{transform_indices = @transform_0, window_bounds = array<i64: 8, 16>}, {pipeline_mode = #tpu.pipeline_mode<synchronous>, transform_indices = @transform_1, window_bounds = array<i64: 16, 128>}, {pipeline_mode = #tpu.pipeline_mode<synchronous>, transform_indices = @transform_2, window_bounds = array<i64: 1, 128>}, {transform_indices = @transform_3, window_bounds = array<i64: 8, 128>}]} {
    %c0 = arith.constant 0 : index
    %c0_0 = arith.constant 0 : index
    %0 = vector.load %arg1[%c0, %c0_0] : memref<8x16xf32, #tpu.memory_space<vmem>>, vector<8x16xf32>
    %c0_1 = arith.constant 0 : index
    %c0_2 = arith.constant 0 : index
    %1 = vector.load %arg2[%c0_1, %c0_2] : memref<16x128xf32, #tpu.memory_space<vmem>>, vector<16x128xf32>
    %cst = arith.constant dense<0.000000e+00> : vector<8x128xf32>
    %2 = tpu.matmul %0, %1, %cst {dimension_numbers = #tpu.dot_dimension_numbers<[1], [0], [0], [1], [0, 0, 1, 1], [], []>} : vector<8x16xf32>, vector<16x128xf32>, vector<8x128xf32> -> vector<8x128xf32>
    %c0_3 = arith.constant 0 : index
    %c0_4 = arith.constant 0 : index
    %3 = vector.load %arg3[%c0_3, %c0_4] : memref<1x128xf32, #tpu.memory_space<vmem>>, vector<1x128xf32>
    %4 = vector.broadcast %3 : vector<1x128xf32> to vector<8x128xf32>
    %5 = arith.addf %2, %4 : vector<8x128xf32>
    %c0_5 = arith.constant 0 : index
    %c0_6 = arith.constant 0 : index
    %6 = vector.load %arg4[%c0_5, %c0_6] : memref<8x128xf32, #tpu.memory_space<vmem>>, vector<8x128xf32>
    tpu.vector_store %arg4[%c0_5, %c0_6], %5 {strides = array<i32>} : memref<8x128xf32, #tpu.memory_space<vmem>>, vector<8x128xf32>,
    return
  }
  func.func @transform_0(%arg0: i32) -> (i32, i32) {
    %c0_i32 = arith.constant 0 : i32
    %c0_i32_0 = arith.constant 0 : i32
    return %arg0, %c0_i32 : i32, i32
  }
  func.func @transform_1(%arg0: i32) -> (i32, i32) {
    %c0_i32 = arith.constant 0 : i32
    %c0_i32_0 = arith.constant 0 : i32
    %c0_i32_1 = arith.constant 0 : i32
    return %c0_i32, %c0_i32_0 : i32, i32
  }
  func.func @transform_2(%arg0: i32) -> (i32, i32) {
    %c0_i32 = arith.constant 0 : i32
    %c0_i32_0 = arith.constant 0 : i32
    %c0_i32_1 = arith.constant 0 : i32
    return %c0_i32, %c0_i32_0 : i32, i32
  }
  func.func @transform_3(%arg0: i32) -> (i32, i32) {
    %c0_i32 = arith.constant 0 : i32
    %c0_i32_0 = arith.constant 0 : i32
    return %arg0, %c0_i32 : i32, i32
  }
}

</mosaic_0001>

<bundles_post_ra>
// kernel: tpu_custom_call.1
= control target key start
LH: loop header
LB: loop body
LE: loop exit
PB: predicated region body
PF: predicated region fallthrough
CT: control target
= control target key end

     0   :  { %8 = vsyncpa [#allocation3], 0  ;;  %s280_s0 = inlined_call_operand.hbm [shape: f32[4,16], index: 0, kind: input, shape index: {}]   ;;  %s281_s1 = inlined_call_operand.hbm [shape: f32[16,128], index: 1, kind: input, shape index: {}]   ;;  %s282_s2 = inlined_call_operand.vmem [shape: f32[1,128], index: 2, kind: input, shape index: {}]   ;;  %s283_s3 = inlined_call_operand.hbm [shape: f32[4,128], index: 3, kind: output, shape index: {}]  }
   0x1   :  { %9 = vsyncpa [#allocation6], 0 }
   0x2   :  { %10 = vsyncpa [#allocation4], 0 }
   0x3   :  { %15 = vsyncadd [#allocation3], 64  ;;  %s233_s12 = smov [#allocation2]  }
   0x4   :  { %s16_s13 = sshll.u32 %s233_s12, 4  ;;  %s17_s13 = int_to_ptr.vmem [resolvable:$true] %s16_s13 }
   0x5   :  { %s175_s14 = scalar_lea.vmem %s17_s13, 64  ;;  %s179_s15 = scalar_lea.vmem %s17_s13, 128 }
   0x6   :  { %p176_p0 = scmp.ne.s32.totalorder %s17_s13, %s175_s14  ;;  %p180_p1 = scmp.lt.s32.totalorder %s17_s13, %s17_s13 }
   0x7   :  { %p181_p2 = scmp.lt.s32.totalorder %s179_s15, %s175_s14 }
   0x9   :  { %p182_p3 = por %p181_p2, %p180_p1 }
   0xb   :  { %p183_p4 = pnand %p182_p3, %p176_p0 }
   0xd   :  { %186 = shalt.err (!%p183_p4)
}
   0xe   :  { %s234_s16 = smov 64   ;;  %s235_s17 = smov 4  }
   0xf   :  { %22 = dma.hbm_to_vmem [thread:$0]  %s280_s0, 64, %s17_s13, [#allocation3], %s234_s16, %s234_s16, %s235_s17  }
  0x10   :  { %s236_s20 = smov [#allocation5]  }
  0x11   :  { %s28_s21 = sshll.u32 %s236_s20, 4  ;;  %s29_s21 = int_to_ptr.vmem [resolvable:$true] %s28_s21 }
  0x12   :  { %s195_s22 = scalar_lea.vmem %s29_s21, 256  ;;  %p200_p6 = scmp.lt.s32.totalorder %s29_s21, %s29_s21 }
  0x13   :  { %p196_p5 = scmp.ne.s32.totalorder %s29_s21, %s195_s22  ;;  %p201_p7 = scmp.lt.s32.totalorder %s195_s22, %s195_s22 }
  0x15   :  { %p202_p8 = por %p201_p7, %p200_p6 }
  0x17   :  { %p203_p9 = pnand %p202_p8, %p196_p5 }
  0x19   :  { %206 = shalt.err (!%p203_p9)
}
  0x1a   :  { %s237_s23 = smov 128   ;;  %s238_s24 = smov 8  }
  0x1b   :  { %34 = dma.hbm_to_vmem [thread:$0]  %s281_s1, 256, %s29_s21, [#allocation6], %s237_s23, %s237_s23, %s238_s24  }
  0x1c   :  { %227 = dma.done.wait [#allocation3], 128  }
  0x1d   :  { %228 = vsyncadd [#allocation3], 4294967168 }
  0x1e   :  { %229 = dma.done.wait [#allocation6], 256  }
  0x1f   :  { %230 = vsyncadd [#allocation6], 4294967040  ;;  %v239_v0 = vmov 0.0   ;;  %vm240_vm0 = vmmov 0   ;;  %v45_v1 = vld [vmem:[#allocation5 + $0x8] sm:$0xff]  ;;  %v44_v2 = vld [vmem:[#allocation5] sm:$0xff] }
  0x20   :  { %151 = vmatprep.subr.mxu0 %v239_v0  ;;  %155 = vmatprep.mubr.msk.f32.mxu0 %vm240_vm0, %v239_v0  ;;  %v43_v3 = vld [vmem:[#allocation2] sm:$0xff]  ;;  %vm53_vm1 = vcmask 130048  }
  0x21   :  { %152 = vmatpush3.msra.mxu0 %v45_v1  ;;  %v146_v4 = vld [vmem:[%s282_s2] ss:$0 sm:$0xff] }
  0x22   :  { %153 = vmatprep.subr.mxu0 %v239_v0 }
  0x23   :  { %154 = vmatpush3.msra.mxu0 %v44_v2 }
  0x24   :  { %156 = vmatmul.mubr.msk.f32.vlgmr.msra.gmra.mxu0 %vm53_vm1, %v43_v3 }
  0xe4   :  { %v123_v5 = vpop.f32.mrf.mxu0 }
  0xe5   :  { %v124_v6 = vadd.f32 %v146_v4, %v123_v5 }
  0xe6   :  { %v157_v7 = vpop.f32.mrf.mxu0 }
  0xe7   :  { %127 = vst [vmem:[#allocation7] sm:$0xff] %v124_v6 }
  0xe8   :  { %132 = vsyncadd [#allocation4], 64  ;;  %s241_s1 = smov [#allocation7]  }
  0xe9   :  { %s133_s28 = sshll.u32 %s241_s1, 4  ;;  %s134_s28 = int_to_ptr.vmem [resolvable:$true] %s133_s28 }
  0xea   :  { %s207_s29 = scalar_lea.vmem %s134_s28, 64  ;;  %s211_s30 = scalar_lea.vmem %s134_s28, 128 }
  0xeb   :  { %p208_p10 = scmp.ne.s32.totalorder %s134_s28, %s207_s29  ;;  %p212_p11 = scmp.lt.s32.totalorder %s134_s28, %s134_s28 }
  0xec   :  { %p213_p12 = scmp.lt.s32.totalorder %s211_s30, %s207_s29 }
  0xee   :  { %p214_p13 = por %p213_p12, %p212_p11 }
  0xf0   :  { %p215_p0 = pnand %p214_p13, %p208_p10 }
  0xf2   :  { %218 = shalt.err (!%p215_p0)
}
  0xf3   :  { %139 = dma.vmem_to_hbm [thread:$0]  %s134_s28, 64, %s283_s3, [#allocation4], %s234_s16, %s234_s16, %s235_s17  }
  0xf4   :  { %231 = dma.done.wait [#allocation4], 128  }
  0xf5   :  { %232 = vsyncadd [#allocation4], 4294967168 }
  0xf6   :  { %143 = vsyncpa [#allocation3], 1 }
  0xf7   :  { %144 = vsyncpa [#allocation6], 1 }
  0xf8   :  { %145 = vsyncpa [#allocation4], 1 }

</bundles_post_ra>
